<compile_context>
chip_gen: v7x
topology: tpu7x:2x2x1
jax: 0.10.0
libtpu: 0.0.40
codegen_flags: <defaults>
</compile_context>

<pallas_src>
import functools
import math

import jax
import jax.numpy as jnp
from jax.experimental import pallas as pl
from jax.experimental.pallas import tpu as pltpu


_SUBLANE = {4: 8, 2: 16, 1: 32}   # min second-minor alignment per element byte-width
_VMEM_BUDGET = 48 * 1024 * 1024   # stay well under v7x's 64 MiB physical VMEM/TC


def _round_up(x, m):
    return ((x + m - 1) // m) * m


def _sublane_multiple(dtype):
    return _SUBLANE.get(jnp.dtype(dtype).itemsize, 8)


def _pick_tm(n_rows, d_in, d_out, x_dtype, w_dtype, out_dtype):
    """Row-tile size sized from the VMEM budget: big enough to amortize the
    ~0.35us per-grid-step pipeline overhead, aligned to the input dtype's
    sublane tile, capped at 2048 rows and at the (aligned) row count."""
    sub = _sublane_multiple(x_dtype)
    n_aligned = _round_up(max(int(n_rows), 1), sub)

    x_it = jnp.dtype(x_dtype).itemsize
    w_it = jnp.dtype(w_dtype).itemsize
    o_it = jnp.dtype(out_dtype).itemsize

    # Resident (double-buffered by default) weight + bias footprint.
    weight_bytes = 2 * (d_in * d_out * w_it + d_out * 4)
    # Per-row cost of double-buffered x and out tiles.
    per_row = 2 * (d_in * x_it + d_out * o_it)
    # Use ~1/4 of the budget for the streaming tiles (headroom for layout pad).
    tile_budget = max(_VMEM_BUDGET // 4 - weight_bytes, per_row * sub)

    tm = tile_budget // per_row
    tm = min(tm, 2048, n_aligned)
    tm = max(sub, (tm // sub) * sub)
    return int(tm)


def _linear_bias_kernel(x_ref, w_ref, b_ref, o_ref):
    # x_ref: (tm, D_in)  w_ref: (D_in, D_out)  b_ref: (1, D_out)
    # o_ref: (tm, D_out).  Cast x to the weight's compute dtype in-kernel
    # (spare VPU slots; avoids a separate wrapper-side cast pass over x),
    # accumulate in f32 on the MXU, bias add in f32, cast to the final dtype
    # on store.
    x = x_ref[...].astype(w_ref.dtype)
    acc = jnp.dot(x, w_ref[...], preferred_element_type=jnp.float32)
    o_ref[...] = (acc + b_ref[...]).astype(o_ref.dtype)


@functools.partial(jax.jit, static_argnames=("tm", "out_dtype"))
def _linear_pallas(x2d, w_t, b, tm, out_dtype):
    """x2d: (N, D_in) native dtype, w_t: (D_in, D_out) compute dtype,
    b: (1, D_out) f32 -> (N, D_out) out_dtype.

    Grid is pl.cdiv(N, tm); Pallas masks the ragged last block, so no padding
    of x and no output slice are needed.  Weight/bias use constant index maps
    and stay resident in VMEM across the grid.
    """
    n, d_in = x2d.shape
    d_out = w_t.shape[1]
    grid = pl.cdiv(n, tm)

    x_it = jnp.dtype(x2d.dtype).itemsize
    w_it = jnp.dtype(w_t.dtype).itemsize
    o_it = jnp.dtype(out_dtype).itemsize
    vmem_bytes = (2 * tm * d_in * x_it       # x tiles (double buffered)
                  + 2 * d_in * d_out * w_it  # weight (resident)
                  + 2 * d_out * 4            # bias
                  + 2 * tm * d_out * o_it)   # out tiles (double buffered)
    vmem_limit = int(min(_VMEM_BUDGET, max(4 * 1024 * 1024, 2 * vmem_bytes)))

    return pl.pallas_call(
        _linear_bias_kernel,
        out_shape=jax.ShapeDtypeStruct((n, d_out), out_dtype),
        grid_spec=pltpu.PrefetchScalarGridSpec(
            num_scalar_prefetch=0,
            grid=(grid,),
            in_specs=[
                pl.BlockSpec((tm, d_in), lambda i: (i, 0)),
                # Constant index maps: weight/bias fetched once, stay resident.
                pl.BlockSpec((d_in, d_out), lambda i: (0, 0)),
                pl.BlockSpec((1, d_out), lambda i: (0, 0)),
            ],
            out_specs=pl.BlockSpec((tm, d_out), lambda i: (i, 0)),
        ),
        compiler_params=pltpu.CompilerParams(
            dimension_semantics=("parallel",),
            vmem_limit_bytes=vmem_limit,
        ),
    )(x2d, w_t, b)


class LinearReadout:
    """Session-specific linear readout y = x @ W_s^T + b_s (JAX/Pallas port)."""

    # Below this many HBM bytes moved, pallas_call fixed overhead dominates a
    # memory-bound linear; route to plain XLA instead.
    _MIN_BYTES_FOR_PALLAS = 1 << 20  # ~1 MiB

    def __init__(self, sessions, hidden_dim, out_dim, n_directions=1, key=None,
                 compute_dtype=jnp.bfloat16):
        if key is None:
            key = jax.random.PRNGKey(0)
        in_dim = n_directions * hidden_dim
        self.in_dim = in_dim
        self.compute_dtype = jnp.dtype(compute_dtype)
        self.params = {}          # raw PyTorch-layout params (f32, for reference)
        self._kernel_params = {}  # pre-transposed, compute-dtype params for kernel
        for session in sessions:
            key, kw, kb = jax.random.split(key, 3)
            bound = 1.0 / math.sqrt(in_dim)  # nn.Linear default init range
            d_out = out_dim[session]
            w = jax.random.uniform(kw, (d_out, in_dim), jnp.float32, -bound, bound)
            b = jax.random.uniform(kb, (d_out,), jnp.float32, -bound, bound)
            self.params[session] = (w, b)

            # Hoisted out of the forward pass: transpose to (D_in, D_out) so the
            # kernel computes x_tile @ W (no w.T in the hot path); keep bias f32.
            w_t = jnp.asarray(w.T, dtype=self.compute_dtype)
            b_p = b.reshape(1, d_out).astype(jnp.float32)
            self._kernel_params[session] = (w_t, b_p, d_out)

    def __call__(self, x, session, use_pallas=None):
        w_t, b_p, d_out = self._kernel_params[session]
        lead = x.shape[:-1]
        n = int(math.prod(lead)) if lead else 1
        d_in = x.shape[-1]
        out_dtype = jnp.dtype(x.dtype)
        x2d = x.reshape(n, d_in)

        if use_pallas is None:
            x_it = jnp.dtype(x.dtype).itemsize
            w_it = jnp.dtype(w_t.dtype).itemsize
            bytes_moved = (n * d_in * x_it
                           + n * d_out * out_dtype.itemsize
                           + d_in * d_out * w_it)
            use_pallas = bytes_moved >= self._MIN_BYTES_FOR_PALLAS

        if not use_pallas:
            # Same numerics as the kernel: compute-dtype operands, f32 MXU-style
            # accumulation, f32 bias add, cast to the input dtype.
            y2d = jnp.dot(x2d.astype(w_t.dtype), w_t,
                          preferred_element_type=jnp.float32) + b_p
            return y2d.astype(out_dtype).reshape(*lead, d_out)

        tm = _pick_tm(n, d_in, d_out, x.dtype, w_t.dtype, out_dtype)
        y2d = _linear_pallas(x2d, w_t, b_p, tm, out_dtype)
        return y2d.reshape(*lead, d_out)


if __name__ == "__main__":
    # Small shapes consistent with the module's forward.
    sessions = ["sess_a", "sess_b"]
    hidden_dim = 32
    n_directions = 1
    out_dim = {"sess_a": 16, "sess_b": 24}
    batch, seq = 2, 8

    key = jax.random.PRNGKey(0)
    k_x, k_params = jax.random.split(key)
    x = jax.random.normal(k_x, (batch, seq, n_directions * hidden_dim), jnp.float32)

    ok = True

    # f32 compute path: exact against the PyTorch-style reference.
    readout_f32 = LinearReadout(sessions, hidden_dim, out_dim, n_directions,
                                key=k_params, compute_dtype=jnp.float32)
    for session in sessions:
        w, b = readout_f32.params[session]
        y_ref = x @ w.T + b

        # Pallas path (forced; the auto byte-gate would route these tiny demo
        # shapes to the XLA fallback).
        y = jax.block_until_ready(readout_f32(x, session, use_pallas=True))
        assert y.shape == (batch, seq, out_dim[session]), y.shape
        if not jnp.allclose(y, y_ref, atol=1e-5, rtol=1e-5):
            ok = False

        # Auto-dispatch path (XLA fallback for tiny shapes).
        y_auto = jax.block_until_ready(readout_f32(x, session))
        if not jnp.allclose(y_auto, y_ref, atol=1e-5, rtol=1e-5):
            ok = False

    # Default bf16-operand path (v6e/v7x MXU/bandwidth friendly; f32 accumulation).
    readout_bf16 = LinearReadout(sessions, hidden_dim, out_dim, n_directions,
                                 key=k_params)
    for session in sessions:
        w, b = readout_bf16.params[session]
        y_ref = x @ w.T + b
        y16 = jax.block_until_ready(readout_bf16(x, session, use_pallas=True))
        assert y16.shape == (batch, seq, out_dim[session]), y16.shape
        if not jnp.allclose(y16.astype(jnp.float32), y_ref, atol=5e-2, rtol=5e-2):
            ok = False

    if ok:
        print("KERNEL_OK")
</pallas_src>

<mosaic_0001>
module attributes {stable_mosaic.version = 11 : i64} {
  func.func @_linear_bias_kernel(%arg0: i32, %arg1: memref<16x32xf32, #tpu.memory_space<vmem>>, %arg2: memref<32x16xf32, #tpu.memory_space<vmem>>, %arg3: memref<1x16xf32, #tpu.memory_space<vmem>>, %arg4: memref<16x16xf32, #tpu.memory_space<vmem>>) attributes {dimension_semantics = [#tpu.dimension_semantics<parallel>], iteration_bounds = array<i64: 1>, scalar_prefetch = 0 : i64, scratch_operands = 0 : i64, tpu.core_type = #tpu.core_type<tc>, window_params = [{transform_indices = @transform_0, window_bounds = array<i64: 16, 32>}, {pipeline_mode = #tpu.pipeline_mode<synchronous>, transform_indices = @transform_1, window_bounds = array<i64: 32, 16>}, {pipeline_mode = #tpu.pipeline_mode<synchronous>, transform_indices = @transform_2, window_bounds = array<i64: 1, 16>}, {transform_indices = @transform_3, window_bounds = array<i64: 16, 16>}]} {
    %c0 = arith.constant 0 : index
    %c0_0 = arith.constant 0 : index
    %0 = vector.load %arg1[%c0, %c0_0] : memref<16x32xf32, #tpu.memory_space<vmem>>, vector<16x32xf32>
    %c0_1 = arith.constant 0 : index
    %c0_2 = arith.constant 0 : index
    %1 = vector.load %arg2[%c0_1, %c0_2] : memref<32x16xf32, #tpu.memory_space<vmem>>, vector<32x16xf32>
    %cst = arith.constant dense<0.000000e+00> : vector<16x16xf32>
    %2 = tpu.matmul %0, %1, %cst {dimension_numbers = #tpu.dot_dimension_numbers<[1], [0], [0], [1], [0, 0, 1, 1], [], []>} : vector<16x32xf32>, vector<32x16xf32>, vector<16x16xf32> -> vector<16x16xf32>
    %c0_3 = arith.constant 0 : index
    %c0_4 = arith.constant 0 : index
    %3 = vector.load %arg3[%c0_3, %c0_4] : memref<1x16xf32, #tpu.memory_space<vmem>>, vector<1x16xf32>
    %4 = vector.broadcast %3 : vector<1x16xf32> to vector<16x16xf32>
    %5 = arith.addf %2, %4 : vector<16x16xf32>
    %c0_5 = arith.constant 0 : index
    %c0_6 = arith.constant 0 : index
    %6 = vector.load %arg4[%c0_5, %c0_6] : memref<16x16xf32, #tpu.memory_space<vmem>>, vector<16x16xf32>
    tpu.vector_store %arg4[%c0_5, %c0_6], %5 {strides = array<i32>} : memref<16x16xf32, #tpu.memory_space<vmem>>, vector<16x16xf32>,
    return
  }
  func.func @transform_0(%arg0: i32) -> (i32, i32) {
    %c0_i32 = arith.constant 0 : i32
    %c0_i32_0 = arith.constant 0 : i32
    return %arg0, %c0_i32 : i32, i32
  }
  func.func @transform_1(%arg0: i32) -> (i32, i32) {
    %c0_i32 = arith.constant 0 : i32
    %c0_i32_0 = arith.constant 0 : i32
    %c0_i32_1 = arith.constant 0 : i32
    return %c0_i32, %c0_i32_0 : i32, i32
  }
  func.func @transform_2(%arg0: i32) -> (i32, i32) {
    %c0_i32 = arith.constant 0 : i32
    %c0_i32_0 = arith.constant 0 : i32
    %c0_i32_1 = arith.constant 0 : i32
    return %c0_i32, %c0_i32_0 : i32, i32
  }
  func.func @transform_3(%arg0: i32) -> (i32, i32) {
    %c0_i32 = arith.constant 0 : i32
    %c0_i32_0 = arith.constant 0 : i32
    return %arg0, %c0_i32 : i32, i32
  }
}

</mosaic_0001>

<bundles_post_ra>
// kernel: _linear_pallas.1
= control target key start
LH: loop header
LB: loop body
LE: loop exit
PB: predicated region body
PF: predicated region fallthrough
CT: control target
= control target key end

     0   :  { %vm28_vm0 = vcmask 261120   ;;  %s240_s0 = inlined_call_operand.vmem [shape: f32[16,32], index: 0, kind: input, shape index: {}]   ;;  %s241_s1 = inlined_call_operand.vmem [shape: f32[32,16], index: 1, kind: input, shape index: {}]   ;;  %s242_s2 = inlined_call_operand.vmem [shape: f32[1,16], index: 2, kind: input, shape index: {}]   ;;  %s243_s3 = inlined_call_operand.hbm [shape: f32[16,16], index: 3, kind: output, shape index: {}]  }
   0x1   :  { %v17_v0 = vld [vmem:[%s241_s1] sm:$0xff]  ;;  %v18_v1 = vld [vmem:[%s241_s1 + $0x8] sm:$0xff]  ;;  %v19_v2 = vld [vmem:[%s241_s1 + $0x10] sm:$0xff] }
   0x2   :  { %v149_v3 = vpack.c.bf16 %v18_v1, %v17_v0  ;;  %v20_v4 = vld [vmem:[%s241_s1 + $0x18] sm:$0xff]  ;;  %v15_v5 = vld [vmem:[%s240_s0] sm:$0xff] }
   0x3   :  { %v153_v6 = vpack.c.bf16 %v20_v4, %v19_v2  ;;  %146 = vmatprep.mubr.msk.f32.mxu0 %vm28_vm0, %v15_v5 }
   0x4   :  { %8 = vsyncpa [#allocation3], 0  ;;  %150 = vmatprep.subr.bf16.mxu0 %v149_v3  ;;  %v16_v7 = vld [vmem:[%s240_s0 + $0x8] sm:$0xff]  ;;  %v129_v8 = vld [vmem:[%s242_s2] ss:$0 sm:$0xff]  ;;  %s184_s1 = smov [#allocation2]  }
   0x5   :  { %152 = vmatpush3.bf16.msra.mxu0 %v149_v3  ;;  %s118_s26 = sshll.u32 %s184_s1, 4  ;;  %vm110_vm1 = vcmask 130048   ;;  %s119_s26 = int_to_ptr.vmem [resolvable:$true] %s118_s26 }
   0x6   :  { %154 = vmatprep.subr.bf16.mxu0 %v153_v6  ;;  %s160_s27 = scalar_lea.vmem %s119_s26, 256  ;;  %p165_p1 = scmp.lt.s32.totalorder %s119_s26, %s119_s26 }
   0x7   :  { %p161_p0 = scmp.ne.s32.totalorder %s119_s26, %s160_s27  ;;  %p166_p2 = scmp.lt.s32.totalorder %s160_s27, %s160_s27 }
   0x9   :  { %156 = vmatpush3.bf16.msra.mxu0 %v153_v6  ;;  %p167_p3 = por %p166_p2, %p165_p1 }
   0xb   :  { %p168_p4 = pnand %p167_p3, %p161_p0 }
   0xc   :  { %147 = vmatmul.mubr.msk.f32.vlgmr.msra.gmra.mrb[0].mxu0 %vm28_vm0, %v16_v7 }
  0xdf   :  { %v148_v9 = vpop.f32.mrb[0].mxu0 }
  0xe0   :  { %v107_v10 = vadd.f32 %v148_v9, %v129_v8  ;;  %v101_v11 = vpop.f32.mrb[1].mxu0 }
  0xe1   :  { %v102_v12 = vadd.f32 %v129_v8, %v101_v11 }
  0xe2   :  { %112 = vst.msk [vmem:[#allocation2 + $0x8] sm:$0xff] %vm110_vm1, %v107_v10 }
  0xe3   :  { %111 = vst.msk [vmem:[#allocation2] sm:$0xff] %vm110_vm1, %v102_v12 }
  0xe4   :  { %171 = shalt.err (!%p168_p4)
}
  0xe5   :  { %s172_s2 = scalar_lea.hbm %s243_s3, 256 }
  0xe6   :  { %p173_p5 = scmp.ne.s32.totalorder %s243_s3, %s172_s2  ;;  %p176_p6 = scmp.lt.u32.totalorder %s172_s2, %s243_s3 }
  0xe8   :  { %p178_p7 = pnand %p176_p6, %p173_p5 }
  0xea   :  { %181 = shalt.err (!%p178_p7)
}
  0xeb   :  { %s185_s6 = smov 128   ;;  %s186_s7 = smov 8  }
  0xec   :  { %124 = dma.vmem_to_hbm [thread:$0]  %s119_s26, 256, %s243_s3, [#allocation3], %s185_s6, %s185_s6, %s186_s7  }
  0xed   :  { %182 = dma.done.wait [#allocation3], 256  }
  0xee   :  { %183 = vsyncadd [#allocation3], 4294967040 }
  0xef   :  { %128 = vsyncpa [#allocation3], 1 }

</bundles_post_ra>
